<compile_context>
chip_gen: v5e
topology: v5e:2x2
jax: 0.10.0
libtpu: 0.0.40
codegen_flags: <defaults>
</compile_context>

<pallas_src>
import functools
import math

import jax
import jax.numpy as jnp
from jax import lax
from jax.experimental import pallas as pl
from jax.experimental.pallas import tpu as pltpu

_BF16 = jnp.bfloat16


# ----------------------------------------------------------------------------
# In-kernel math helpers (f32 elementwise; bf16 only at MXU operands)
# ----------------------------------------------------------------------------
def _layernorm(v, g, b, eps=1e-5):
    # torch.nn.LayerNorm (biased variance, eps=1e-5)
    mu = jnp.mean(v, axis=-1, keepdims=True)
    var = jnp.mean((v - mu) ** 2, axis=-1, keepdims=True)
    return (v - mu) * lax.rsqrt(var + eps) * g + b


def _gelu_tanh(x):
    # tanh-approximation GELU: one EUP tanh + ~6 VPU ops.
    # |gelu_tanh - gelu_erf| <= ~3e-3, well inside the test tolerance.
    c = math.sqrt(2.0 / math.pi)
    return 0.5 * x * (1.0 + jnp.tanh(c * (x + 0.044715 * (x * x * x))))


# ----------------------------------------------------------------------------
# Pallas kernels
# ----------------------------------------------------------------------------
def prepare_kernel(p_ref, w_ref, base_ref, o_ref):
    # Fused patch embedding + cls token + pos embedding for one batch element.
    #   p_ref:    (1, Np, D) bf16  patches shifted down by one row (row 0 = CLS slot,
    #                              padded rows are zero)
    #   w_ref:    (D, E)     bf16  flattened Conv2d weight (kernel == stride)
    #   base_ref: (1, Np, E) f32   pos_embed with cls token folded into row 0 and the
    #                              conv bias folded into the patch rows; padding = 0
    o_ref[0] = (jnp.dot(p_ref[0], w_ref[...],
                        preferred_element_type=jnp.float32)
                + base_ref[0]).astype(o_ref.dtype)


def block_kernel(x_ref, g1_ref, be1_ref, wqkv_ref, wp_ref, bp_ref,
                 g2_ref, be2_ref, w1_ref, b1_ref, w2_ref, b2_ref,
                 o_ref, qkv_scr, *, num_heads, n_real):
    # Full transformer Block (pre-norm attention + MLP, residuals) for one batch.
    x = x_ref[0]                                        # (Np, C) f32
    Np, C = x.shape
    hd = C // num_heads

    # Additive key mask for padded token columns.  Padded *query* rows carry
    # garbage activations through all blocks — correct here because only the CLS
    # row is read at the end.
    if n_real < Np:
        key_ids = lax.broadcasted_iota(jnp.int32, (1, Np), 1)
        key_bias = jnp.where(key_ids < n_real, 0.0, -1e30).astype(jnp.float32)
    else:
        key_bias = None

    # --- Attention branch ---
    xn = _layernorm(x, g1_ref[...], be1_ref[...])
    # qkv stored once in a bf16 VMEM scratch; per-head operands are static Ref
    # slices so the (Np, 3C) value never stays live across the unrolled head loop.
    qkv_scr[...] = jnp.dot(xn.astype(_BF16), wqkv_ref[...],
                           preferred_element_type=jnp.float32).astype(_BF16)

    # o_ref doubles as the f32 accumulator for x + proj(attn) + bias.  The output
    # projection is fused per head (pv @ wproj[h*hd:(h+1)*hd, :]) so every store
    # is lane-dense over the full C lanes — no attn_scr, no masked sub-tile vst.
    o_ref[0] = x + bp_ref[...]

    for h in range(num_heads):
        lo = h * hd
        q = qkv_scr[:, lo:lo + hd]                      # scale pre-folded into wqkv
        k = qkv_scr[:, C + lo:C + lo + hd]
        v = qkv_scr[:, 2 * C + lo:2 * C + lo + hd]
        # q @ k^T without materializing the transpose.
        s = lax.dot_general(q, k, (((1,), (1,)), ((), ())),
                            preferred_element_type=jnp.float32)      # (Np, Np)
        if key_bias is not None:
            s = s + key_bias
        s = s - jnp.max(s, axis=-1, keepdims=True)
        p = jnp.exp(s)
        p = p * pl.reciprocal(jnp.sum(p, axis=-1, keepdims=True), approx=True)
        pv = jnp.dot(p.astype(_BF16), v, preferred_element_type=jnp.float32)
        o_ref[0] += jnp.dot(pv.astype(_BF16), wp_ref[lo:lo + hd, :],
                            preferred_element_type=jnp.float32)

    xa = o_ref[0]                                       # x + attention output

    # --- MLP branch ---
    xn2 = _layernorm(xa, g2_ref[...], be2_ref[...])
    h1 = jnp.dot(xn2.astype(_BF16), w1_ref[...],
                 preferred_element_type=jnp.float32) + b1_ref[...]
    h1 = _gelu_tanh(h1)
    h2 = jnp.dot(h1.astype(_BF16), w2_ref[...],
                 preferred_element_type=jnp.float32) + b2_ref[...]
    o_ref[0] = (xa + h2).astype(o_ref.dtype)


def head_kernel(x_ref, g_ref, b_ref, w_ref, bw_ref, o_ref):
    # Final LayerNorm + head_data Linear on the first 8 token rows only (CLS + 7).
    x = x_ref[0]                                        # (8, C)
    xn = _layernorm(x, g_ref[...], b_ref[...])
    o_ref[0] = (jnp.dot(xn.astype(_BF16), w_ref[...],
                        preferred_element_type=jnp.float32)
                + bw_ref[...]).astype(o_ref.dtype)


# ----------------------------------------------------------------------------
# pallas_call wrappers
# ----------------------------------------------------------------------------
@functools.lru_cache(maxsize=None)
def _vmem_cap_bytes():
    # Clamp scoped-VMEM requests to the actual chip (v5e/v6e: 128 MiB, v7x: 64 MiB
    # per TensorCore), leaving ~20% headroom for Mosaic internal scratch.
    try:
        phys = int(pltpu.get_tpu_info().vmem_capacity_bytes)
    except Exception:
        phys = 64 << 20          # conservative fallback: assume v7x-sized VMEM
    return max(int(phys * 0.8), 32 << 20)


def _cparams(est_bytes):
    limit = int(min(max(est_bytes, 32 << 20), _vmem_cap_bytes()))
    return pltpu.CompilerParams(dimension_semantics=("parallel",),
                                vmem_limit_bytes=limit)


def _const_spec(shape):
    # Constant-index blocks (weights / biases / norm params): single-buffered.
    # Double buffering buys no overlap when the block index never changes over the
    # (B,) grid, but doubles weight VMEM — the difference between fitting and
    # spilling on v7x's 64 MiB VMEM for ViT-B/L-scale configs.
    n = len(shape)
    idx = lambda b, _n=n: (0,) * _n
    try:
        return pl.BlockSpec(shape, idx, pipeline_mode=pl.Buffered(1))
    except TypeError:            # older BlockSpec signature without pipeline_mode
        return pl.BlockSpec(shape, idx)


def prepare_tokens(patches_pad, w, base):
    B, Np, D = patches_pad.shape
    E = w.shape[1]
    est = (2 * 2 * Np * D            # bf16 patch tiles, double buffered
           + 2 * 4 * Np * E          # f32 out tiles, double buffered
           + 2 * D * E               # bf16 weight, single buffered
           + 4 * Np * E              # f32 base, single buffered
           + 4 * Np * E              # matmul temporary
           + (8 << 20))
    return pl.pallas_call(
        prepare_kernel,
        out_shape=jax.ShapeDtypeStruct((B, Np, E), jnp.float32),
        grid=(B,),
        in_specs=[pl.BlockSpec((1, Np, D), lambda b: (b, 0, 0)),
                  _const_spec((D, E)),
                  _const_spec((1, Np, E))],
        out_specs=pl.BlockSpec((1, Np, E), lambda b: (b, 0, 0)),
        compiler_params=_cparams(est),
    )(patches_pad, w, base)


def vit_block(x, p, num_heads, n_real):
    B, Np, C = x.shape
    Hm = p["w1"].shape[1]
    kernel = functools.partial(block_kernel, num_heads=num_heads, n_real=n_real)
    wbytes = 2 * (3 * C * C + C * C + 2 * C * Hm)   # bf16 weights, single buffered
    act = (2 * 2 * 4 * Np * C        # x in + out tiles (f32), double buffered
           + 2 * Np * 3 * C          # bf16 qkv scratch
           + 3 * 4 * Np * Np         # per-head score / softmax temporaries (f32)
           + 2 * 4 * Np * Hm         # fc1 output + GELU temporary (f32)
           + 4 * 4 * Np * C)         # layernorm / residual temporaries (f32)
    est = wbytes + act + (8 << 20)   # headroom for Mosaic internal scratch
    return pl.pallas_call(
        kernel,
        out_shape=jax.ShapeDtypeStruct((B, Np, C), jnp.float32),
        grid=(B,),
        in_specs=[pl.BlockSpec((1, Np, C), lambda b: (b, 0, 0)),
                  _const_spec((1, C)), _const_spec((1, C)),      # norm1
                  _const_spec((C, 3 * C)),                       # qkv (no bias, scale folded)
                  _const_spec((C, C)), _const_spec((1, C)),      # proj
                  _const_spec((1, C)), _const_spec((1, C)),      # norm2
                  _const_spec((C, Hm)), _const_spec((1, Hm)),    # fc1
                  _const_spec((Hm, C)), _const_spec((1, C))],    # fc2
        out_specs=pl.BlockSpec((1, Np, C), lambda b: (b, 0, 0)),
        scratch_shapes=[pltpu.VMEM((Np, 3 * C), _BF16)],
        compiler_params=_cparams(est),
    )(x, p["g1"], p["b1"], p["wqkv"], p["wproj"], p["bproj"],
      p["g2"], p["b2"], p["w1"], p["bb1"], p["w2"], p["bb2"])


def vit_head(x, g, b, w, bw, rows=8):
    B, Np, C = x.shape
    E = w.shape[1]
    est = (2 * 4 * rows * (C + E) + 2 * C * E + (8 << 20))
    return pl.pallas_call(
        head_kernel,
        out_shape=jax.ShapeDtypeStruct((B, rows, E), jnp.float32),
        grid=(B,),
        in_specs=[pl.BlockSpec((1, rows, C), lambda b: (b, 0, 0)),
                  _const_spec((1, C)), _const_spec((1, C)),
                  _const_spec((C, E)), _const_spec((1, E))],
        out_specs=pl.BlockSpec((1, rows, E), lambda b: (b, 0, 0)),
        compiler_params=_cparams(est),
    )(x, g, b, w, bw)


# ----------------------------------------------------------------------------
# Glue: patchify (pure reshape/transpose), token assembly, full forward
# ----------------------------------------------------------------------------
def extract_patches(x, p):
    # NCHW -> (B, num_patches, C*p*p), flattened in (C, ph, pw) order so it matches
    # the Conv2d(kernel=stride=p) weight flattening.
    B, C, H, W = x.shape
    x = x.reshape(B, C, H // p, p, W // p, p)
    x = x.transpose(0, 2, 4, 1, 3, 5)
    return x.reshape(B, (H // p) * (W // p), C * p * p)


def vit_forward(params, x, num_heads):
    B = x.shape[0]
    ps = params["patch_size"]
    patches = extract_patches(x, ps)                       # (B, P, D)
    P, D = patches.shape[1], patches.shape[2]
    E = params["patch_w"].shape[1]
    n_real = P + 1
    n_pad = ((n_real + 127) // 128) * 128                  # lane-dense token axis

    # Shift patches down by one row (row 0 = CLS slot), zero-pad to n_pad rows,
    # and carry them in bf16 (they are MXU operands anyway) to halve the input DMA.
    patches_pad = jnp.zeros((B, n_pad, D), _BF16).at[:, 1:n_real, :].set(
        patches.astype(_BF16))
    # Fold cls token, positional embedding and conv bias into one additive "base".
    cls_row = params["cls_token"][:, 0] + params["pos_embed"][:, 0]        # (1, E)
    patch_rows = params["pos_embed"][:, 1:] + params["patch_b"]            # (1, P, E)
    pad_rows = jnp.zeros((1, n_pad - n_real, E), jnp.float32)
    base = jnp.concatenate([cls_row[:, None, :], patch_rows, pad_rows], axis=1)

    tok = prepare_tokens(patches_pad, params["patch_w"], base)             # (B, Np, E)
    for blk in params["blocks"]:
        tok = vit_block(tok, blk, num_heads, n_real)       # pos_drop / DropPath = identity
    out = vit_head(tok, params["ln_g"], params["ln_b"],
                   params["head_w"], params["head_b"])                     # (B, 8, E)
    # headClass with num_classes=0 -> nn.Identity applied to the CLS token
    return out[:, 0]                                                       # (B, E)


# ----------------------------------------------------------------------------
# Deterministic parameter initialization (mirrors __init__ shapes)
# ----------------------------------------------------------------------------
def init_params(key, *, img_size, patch_size, in_chans, embed_dim, depth,
                num_heads, mlp_ratio):
    assert embed_dim % num_heads == 0
    num_patches = (img_size // patch_size) ** 2
    hidden = int(embed_dim * mlp_ratio)
    scale = (embed_dim // num_heads) ** -0.5
    keys = jax.random.split(key, 5 + depth)

    def tn(k, shape, std=0.02):
        return std * jax.random.truncated_normal(k, -2.0, 2.0, shape, jnp.float32)

    conv_w = tn(keys[0], (embed_dim, in_chans, patch_size, patch_size))
    params = {
        "patch_size": patch_size,
        # MXU weights stored pre-transposed (in, out) and in bf16.
        "patch_w": conv_w.reshape(embed_dim, -1).T.astype(_BF16),   # (Cin*p*p, E)
        "patch_b": tn(keys[1], (1, embed_dim)),
        "cls_token": tn(keys[2], (1, 1, embed_dim)),
        "pos_embed": tn(keys[3], (1, num_patches + 1, embed_dim)),
        "ln_g": jnp.ones((1, embed_dim), jnp.float32),
        "ln_b": jnp.zeros((1, embed_dim), jnp.float32),
        "head_w": tn(keys[4], (embed_dim, embed_dim)).T.astype(_BF16),   # head_data
        "head_b": jnp.zeros((1, embed_dim), jnp.float32),
        "blocks": [],
    }
    for i in range(depth):
        bk = jax.random.split(keys[5 + i], 4)
        wqkv = tn(bk[0], (3 * embed_dim, embed_dim)).T                   # (C, 3C)
        # Fold the attention scale into the q columns (exact reparameterization of
        # softmax((q @ k^T) * scale)); done in f32 before the bf16 cast.
        wqkv = wqkv.at[:, :embed_dim].multiply(scale)
        params["blocks"].append({
            "g1": jnp.ones((1, embed_dim), jnp.float32),
            "b1": jnp.zeros((1, embed_dim), jnp.float32),
            "wqkv": wqkv.astype(_BF16),                                  # qkv_bias=False
            "wproj": tn(bk[1], (embed_dim, embed_dim)).T.astype(_BF16),
            "bproj": jnp.zeros((1, embed_dim), jnp.float32),
            "g2": jnp.ones((1, embed_dim), jnp.float32),
            "b2": jnp.zeros((1, embed_dim), jnp.float32),
            "w1": tn(bk[2], (hidden, embed_dim)).T.astype(_BF16),
            "bb1": jnp.zeros((1, hidden), jnp.float32),
            "w2": tn(bk[3], (embed_dim, hidden)).T.astype(_BF16),
            "bb2": jnp.zeros((1, embed_dim), jnp.float32),
        })
    return params


# ----------------------------------------------------------------------------
# Pure-JAX reference (same bf16 cast points; exact softmax and exact erf GELU)
# ----------------------------------------------------------------------------
def vit_reference(params, x, num_heads):
    bf = _BF16

    def mm(a, w):
        return jnp.dot(a.astype(bf), w, preferred_element_type=jnp.float32)

    ps = params["patch_size"]
    patches = extract_patches(x, ps)
    tok = mm(patches, params["patch_w"]) + params["patch_b"]
    B, P, E = tok.shape
    cls = jnp.broadcast_to(params["cls_token"], (B, 1, E))
    tok = jnp.concatenate([cls, tok], axis=1) + params["pos_embed"]

    def ln(v, g, b):
        mu = v.mean(-1, keepdims=True)
        var = ((v - mu) ** 2).mean(-1, keepdims=True)
        return (v - mu) / jnp.sqrt(var + 1e-5) * g + b

    C = E
    hd = C // num_heads
    N = tok.shape[1]
    for blk in params["blocks"]:
        xn = ln(tok, blk["g1"], blk["b1"])
        qkv = mm(xn, blk["wqkv"])
        q = qkv[..., :C].reshape(B, N, num_heads, hd).transpose(0, 2, 1, 3)
        k = qkv[..., C:2 * C].reshape(B, N, num_heads, hd).transpose(0, 2, 1, 3)
        v = qkv[..., 2 * C:].reshape(B, N, num_heads, hd).transpose(0, 2, 1, 3)
        # NOTE: attention scale is pre-folded into the q columns of wqkv.
        a = jnp.einsum("bhqd,bhkd->bhqk", q.astype(bf), k.astype(bf),
                       preferred_element_type=jnp.float32)
        a = jax.nn.softmax(a, axis=-1)
        o = jnp.einsum("bhqk,bhkd->bhqd", a.astype(bf), v.astype(bf),
                       preferred_element_type=jnp.float32)
        o = o.transpose(0, 2, 1, 3).reshape(B, N, C)
        tok = tok + (mm(o, blk["wproj"]) + blk["bproj"])
        xn2 = ln(tok, blk["g2"], blk["b2"])
        h1 = mm(xn2, blk["w1"]) + blk["bb1"]
        h1 = 0.5 * h1 * (1.0 + lax.erf(h1 / jnp.sqrt(2.0)))
        tok = tok + (mm(h1, blk["w2"]) + blk["bb2"])
    xn = ln(tok, params["ln_g"], params["ln_b"])
    out = mm(xn, params["head_w"]) + params["head_b"]
    return out[:, 0]


# TODO(synk): interpolate_pos_encoding (bicubic resize) is only hit for mismatched
# resolutions and has no clean Pallas equivalent; the identity path is implemented.

if __name__ == "__main__":
    # Small configuration consistent with the module's forward:
    B, Cin, IMG, PATCH = 2, 3, 16, 4
    EMBED, DEPTH, HEADS, MLP_RATIO = 32, 2, 4, 4.0

    key = jax.random.PRNGKey(0)
    kparam, kx = jax.random.split(key)
    params = init_params(kparam, img_size=IMG, patch_size=PATCH, in_chans=Cin,
                         embed_dim=EMBED, depth=DEPTH, num_heads=HEADS,
                         mlp_ratio=MLP_RATIO)
    x = jax.random.normal(kx, (B, Cin, IMG, IMG), jnp.float32)

    out = vit_forward(params, x, HEADS)
    jax.block_until_ready(out)
    assert out.shape == (B, EMBED), out.shape

    ref = vit_reference(params, x, HEADS)
    jax.block_until_ready(ref)
    err = float(jnp.max(jnp.abs(out - ref)))
    # Deviations: tanh-GELU vs exact erf, approx softmax reciprocal, bf16 rounding.
    assert err < 3e-2, err

    print("KERNEL_OK")
</pallas_src>

<mosaic_0001>
module attributes {stable_mosaic.version = 11 : i64} {
  func.func @prepare_kernel(%arg0: i32, %arg1: memref<1x128x48xbf16, #tpu.memory_space<vmem>>, %arg2: memref<48x32xbf16, #tpu.memory_space<vmem>>, %arg3: memref<1x128x32xf32, #tpu.memory_space<vmem>>, %arg4: memref<1x128x32xf32, #tpu.memory_space<vmem>>) attributes {dimension_semantics = [#tpu.dimension_semantics<parallel>], iteration_bounds = array<i64: 2>, scalar_prefetch = 0 : i64, scratch_operands = 0 : i64, tpu.core_type = #tpu.core_type<tc>, window_params = [{transform_indices = @transform_0, window_bounds = array<i64: 1, 128, 48>}, {pipeline_mode = #tpu.pipeline_mode<synchronous>, transform_indices = @transform_1, window_bounds = array<i64: 48, 32>}, {pipeline_mode = #tpu.pipeline_mode<synchronous>, transform_indices = @transform_2, window_bounds = array<i64: 1, 128, 32>}, {transform_indices = @transform_3, window_bounds = array<i64: 1, 128, 32>}]} {
    %c0 = arith.constant 0 : index
    %c0_0 = arith.constant 0 : index
    %c0_1 = arith.constant 0 : index
    %0 = vector.load %arg1[%c0, %c0_0, %c0_1] : memref<1x128x48xbf16, #tpu.memory_space<vmem>>, vector<1x128x48xbf16>
    %1 = vector.shape_cast %0 : vector<1x128x48xbf16> to vector<128x48xbf16>
    %c0_2 = arith.constant 0 : index
    %c0_3 = arith.constant 0 : index
    %2 = vector.load %arg2[%c0_2, %c0_3] : memref<48x32xbf16, #tpu.memory_space<vmem>>, vector<48x32xbf16>
    %cst = arith.constant dense<0.000000e+00> : vector<128x32xf32>
    %3 = tpu.matmul %1, %2, %cst {dimension_numbers = #tpu.dot_dimension_numbers<[1], [0], [0], [1], [0, 0, 1, 1], [], []>} : vector<128x48xbf16>, vector<48x32xbf16>, vector<128x32xf32> -> vector<128x32xf32>
    %c0_4 = arith.constant 0 : index
    %c0_5 = arith.constant 0 : index
    %c0_6 = arith.constant 0 : index
    %4 = vector.load %arg3[%c0_4, %c0_5, %c0_6] : memref<1x128x32xf32, #tpu.memory_space<vmem>>, vector<1x128x32xf32>
    %5 = vector.shape_cast %4 : vector<1x128x32xf32> to vector<128x32xf32>
    %6 = arith.addf %3, %5 : vector<128x32xf32>
    %c0_7 = arith.constant 0 : index
    %c0_8 = arith.constant 0 : index
    %c0_9 = arith.constant 0 : index
    %7 = vector.load %arg4[%c0_7, %c0_8, %c0_9] : memref<1x128x32xf32, #tpu.memory_space<vmem>>, vector<1x128x32xf32>
    %8 = vector.shape_cast %7 : vector<1x128x32xf32> to vector<128x32xf32>
    %9 = vector.shape_cast %6 : vector<128x32xf32> to vector<1x128x32xf32>
    tpu.vector_store %arg4[%c0_7, %c0_8, %c0_9], %9 {strides = array<i32>} : memref<1x128x32xf32, #tpu.memory_space<vmem>>, vector<1x128x32xf32>,
    return
  }
  func.func @transform_0(%arg0: i32) -> (i32, i32, i32) {
    %c0_i32 = arith.constant 0 : i32
    %c0_i32_0 = arith.constant 0 : i32
    %c0_i32_1 = arith.constant 0 : i32
    return %arg0, %c0_i32, %c0_i32_0 : i32, i32, i32
  }
  func.func @transform_1(%arg0: i32) -> (i32, i32) {
    %c0_i32 = arith.constant 0 : i32
    %c0_i32_0 = arith.constant 0 : i32
    %c0_i32_1 = arith.constant 0 : i32
    return %c0_i32, %c0_i32_0 : i32, i32
  }
  func.func @transform_2(%arg0: i32) -> (i32, i32, i32) {
    %c0_i32 = arith.constant 0 : i32
    %c0_i32_0 = arith.constant 0 : i32
    %c0_i32_1 = arith.constant 0 : i32
    %c0_i32_2 = arith.constant 0 : i32
    return %c0_i32, %c0_i32_0, %c0_i32_1 : i32, i32, i32
  }
  func.func @transform_3(%arg0: i32) -> (i32, i32, i32) {
    %c0_i32 = arith.constant 0 : i32
    %c0_i32_0 = arith.constant 0 : i32
    %c0_i32_1 = arith.constant 0 : i32
    return %arg0, %c0_i32, %c0_i32_0 : i32, i32, i32
  }
}

</mosaic_0001>

<bundles_post_ra>
// kernel: tpu_custom_call.1
= control target key start
LH: loop header
LB: loop body
LE: loop exit
PB: predicated region body
PF: predicated region fallthrough
CT: control target
= control target key end

     0   :  { %s535_s12 = smov 0   ;;  %s655_s0 = inlined_call_operand.vmem [shape: bf16[2,128,48], index: 0, kind: input, shape index: {}]   ;;  %s656_s1 = inlined_call_operand.vmem [shape: bf16[48,32], index: 1, kind: input, shape index: {}]   ;;  %s657_s2 = inlined_call_operand.vmem [shape: f32[1,128,32], index: 2, kind: input, shape index: {}]   ;;  %s658_s3 = inlined_call_operand.vmem [shape: f32[2,128,32], index: 3, kind: output, shape index: {}]  }
   0x1 LB: > { %s414_s13 = sadd.s32 4294967295, %s513_s12   ;;  %p418_p0 = scmp.ge.s32.totalorder %s513_s12, 1  ;;  %s513_s12 = sphi %s535_s12, %s13_s12  }
   0x2   : > { %p137_p1 = scmp.lt.s32.totalorder %s513_s12, 3 }
   0x4   : > { %p138_p2 = pnand %p418_p0, %p137_p1 }
   0x5   : > { %p161_p3 = scmp.lt.s32.totalorder (!%p138_p2), %s414_s13, 1 }
   0x6   : > { %141 = sbr.rel (%p138_p2) target bundleno = 184 (0xb8), region = 32 }
   0xb   : > { %v489_v0 = vld [vmem:[%s656_s1 + $0x10] sm:$0xff]  ;;  %v488_v1 = vld [vmem:[%s656_s1 + $0x8] sm:$0xff]  ;;  %s660_s13 = smov (!%p161_p3, %s414_s13), 1  ;;  %v487_v2 = vld [vmem:[%s656_s1] sm:$0xff]  ;;  %vm268_vm0 = vcmask 392192   ;;  %vm342_vm1 = vcmask 261120  }
   0xc   : > { %298 = vmatpush.bf16.msra.mxu0 %v489_v0  ;;  %490 = vmatpush.bf16.msra.mxu1 %v489_v0  ;;  %s477_s18 = sshll.u32 %s660_s13, 6  ;;  %s478_s24 = sshll.u32 %s660_s13, 7  ;;  %v194_v11 = vld [vmem:[%s657_s2] sm:$0xff]  ;;  %v195_v19 = vld [vmem:[%s657_s2 + $0x8] sm:$0xff]  ;;  %v196_v31 = vld [vmem:[%s657_s2 + $0x10] sm:$0xff] }
   0xd   : > { %491 = vmatpush.bf16.msra.mxu2 %v489_v0  ;;  %492 = vmatpush.bf16.msra.mxu3 %v489_v0  ;;  %s165_s23 = scalar_lea.vmem %s655_s0, %s477_s18  ;;  %v198_v12 = vld [vmem:[%s657_s2 + $0x20] sm:$0xff]  ;;  %s576_s4 = scalar_lea.vmem %s658_s3, %s478_s24  ;;  %v199_v20 = vld [vmem:[%s657_s2 + $0x28] sm:$0xff]  ;;  %v200_v32 = vld [vmem:[%s657_s2 + $0x30] sm:$0xff] }
   0xe   : > { %v479_v3 = vld [vmem:[%s165_s23] sm:$0xff]  ;;  %v481_v4 = vld [vmem:[%s165_s23 + $0x10] sm:$0xff]  ;;  %v480_v7 = vld [vmem:[%s165_s23 + $0x8] sm:$0xff] }
   0xf   : > { %v483_v5 = vld [vmem:[%s165_s23 + $0x20] sm:$0xff]  ;;  %v485_v6 = vld [vmem:[%s165_s23 + $0x30] sm:$0xff]  ;;  %v482_v8 = vld [vmem:[%s165_s23 + $0x18] sm:$0xff] }
  0x10   : > { %299 = vmatpush.bf16.msra.mxu0 %v488_v1  ;;  %493 = vmatpush.bf16.msra.mxu1 %v488_v1  ;;  %v484_v9 = vld [vmem:[%s165_s23 + $0x28] sm:$0xff]  ;;  %v486_v10 = vld [vmem:[%s165_s23 + $0x38] sm:$0xff]  ;;  %v202_v17 = vld [vmem:[%s657_s2 + $0x40] sm:$0xff] }
  0x11   : > { %494 = vmatpush.bf16.msra.mxu2 %v488_v1  ;;  %495 = vmatpush.bf16.msra.mxu3 %v488_v1  ;;  %v206_v18 = vld [vmem:[%s657_s2 + $0x60] sm:$0xff]  ;;  %v203_v29 = vld [vmem:[%s657_s2 + $0x48] sm:$0xff]  ;;  %v204_v41 = vld [vmem:[%s657_s2 + $0x50] sm:$0xff] }
  0x12   : > { %v207_v30 = vld [vmem:[%s657_s2 + $0x68] sm:$0xff]  ;;  %v208_v42 = vld [vmem:[%s657_s2 + $0x70] sm:$0xff]  ;;  %v197_v43 = vld [vmem:[%s657_s2 + $0x18] sm:$0xff] }
  0x13   : > { %v201_v44 = vld [vmem:[%s657_s2 + $0x38] sm:$0xff] }
  0x14   : > { %300 = vmatpush.bf16.msra.mxu0 %v487_v2  ;;  %496 = vmatpush.bf16.msra.mxu1 %v487_v2  ;;  %v205_v53 = vld [vmem:[%s657_s2 + $0x58] sm:$0xff] }
  0x15   : > { %497 = vmatpush.bf16.msra.mxu2 %v487_v2  ;;  %498 = vmatpush.bf16.msra.mxu3 %v487_v2  ;;  %v209_v54 = vld [vmem:[%s657_s2 + $0x78] sm:$0xff] }
  0x17   : > { %467 = vmatmul.msk.bf16.vlgmr.msra.gmra.mxu0 %vm268_vm0, %v479_v3  ;;  %469 = vmatmul.msk.bf16.vlgmr.msra.gmra.mxu1 %vm268_vm0, %v481_v4 }
  0x18   : > { %471 = vmatmul.msk.bf16.vlgmr.msra.gmra.mxu2 %vm268_vm0, %v483_v5  ;;  %473 = vmatmul.msk.bf16.vlgmr.msra.gmra.mxu3 %vm268_vm0, %v485_v6 }
  0x27   : > { %468 = vmatmul.msk.bf16.gmra.mxu0 %vm268_vm0, %v480_v7  ;;  %470 = vmatmul.msk.bf16.gmra.mxu1 %vm268_vm0, %v482_v8 }
  0x28   : > { %472 = vmatmul.msk.bf16.gmra.mxu2 %vm268_vm0, %v484_v9  ;;  %474 = vmatmul.msk.bf16.gmra.mxu3 %vm268_vm0, %v486_v10 }
  0x94   : > { %v302_v13 = vpop.f32.mrf.mxu0  ;;  %v312_v14 = vpop.f32.mrf.mxu1 }
  0x95   : > { %v303_v15 = vadd.f32 %v302_v13, %v194_v11  ;;  %v313_v16 = vadd.f32 %v312_v14, %v198_v12 }
  0x97   : > { %343 = vst.msk [vmem:[%s576_s4] sm:$0xff] %vm342_vm1, %v303_v15 }
  0x98   : > { %347 = vst.msk [vmem:[%s576_s4 + $0x20] sm:$0xff] %vm342_vm1, %v313_v16 }
  0x9b   : > { %v322_v21 = vpop.f32.mrf.mxu2  ;;  %v332_v22 = vpop.f32.mrf.mxu3 }
  0x9c   : > { %v323_v23 = vadd.f32 %v322_v21, %v202_v17  ;;  %v333_v24 = vadd.f32 %v332_v22, %v206_v18  ;;  %v304_v25 = vpop.f32.mrf.mxu0  ;;  %v314_v26 = vpop.f32.mrf.mxu1 }
  0x9d   : > { %v305_v27 = vadd.f32 %v304_v25, %v195_v19  ;;  %v315_v28 = vadd.f32 %v314_v26, %v199_v20 }
  0x9e   : > { %351 = vst.msk [vmem:[%s576_s4 + $0x40] sm:$0xff] %vm342_vm1, %v323_v23 }
  0x9f   : > { %355 = vst.msk [vmem:[%s576_s4 + $0x60] sm:$0xff] %vm342_vm1, %v333_v24 }
  0xa0   : > { %344 = vst.msk [vmem:[%s576_s4 + $0x8] sm:$0xff] %vm342_vm1, %v305_v27 }
  0xa1   : > { %348 = vst.msk [vmem:[%s576_s4 + $0x28] sm:$0xff] %vm342_vm1, %v315_v28 }
  0xa3   : > { %v324_v33 = vpop.f32.mrf.mxu2  ;;  %v334_v34 = vpop.f32.mrf.mxu3 }
  0xa4   : > { %v325_v35 = vadd.f32 %v324_v33, %v203_v29  ;;  %v335_v36 = vadd.f32 %v334_v34, %v207_v30  ;;  %v307_v37 = vpop.f32.mrf.mxu0  ;;  %v317_v38 = vpop.f32.mrf.mxu1 }
  0xa5   : > { %v308_v39 = vadd.f32 %v307_v37, %v196_v31  ;;  %v318_v40 = vadd.f32 %v317_v38, %v200_v32 }
  0xa6   : > { %352 = vst.msk [vmem:[%s576_s4 + $0x48] sm:$0xff] %vm342_vm1, %v325_v35 }
  0xa7   : > { %356 = vst.msk [vmem:[%s576_s4 + $0x68] sm:$0xff] %vm342_vm1, %v335_v36 }
  0xa8   : > { %345 = vst.msk [vmem:[%s576_s4 + $0x10] sm:$0xff] %vm342_vm1, %v308_v39 }
  0xa9   : > { %349 = vst.msk [vmem:[%s576_s4 + $0x30] sm:$0xff] %vm342_vm1, %v318_v40 }
  0xab   : > { %v327_v45 = vpop.f32.mrf.mxu2  ;;  %v337_v46 = vpop.f32.mrf.mxu3 }
  0xac   : > { %v328_v47 = vadd.f32 %v327_v45, %v204_v41  ;;  %v338_v48 = vadd.f32 %v337_v46, %v208_v42  ;;  %v309_v49 = vpop.f32.mrf.mxu0  ;;  %v319_v50 = vpop.f32.mrf.mxu1 }
  0xad   : > { %v310_v51 = vadd.f32 %v309_v49, %v197_v43  ;;  %v320_v52 = vadd.f32 %v319_v50, %v201_v44 }
  0xae   : > { %353 = vst.msk [vmem:[%s576_s4 + $0x50] sm:$0xff] %vm342_vm1, %v328_v47 }
  0xaf   : > { %357 = vst.msk [vmem:[%s576_s4 + $0x70] sm:$0xff] %vm342_vm1, %v338_v48 }
  0xb0   : > { %346 = vst.msk [vmem:[%s576_s4 + $0x18] sm:$0xff] %vm342_vm1, %v310_v51 }
  0xb1   : > { %350 = vst.msk [vmem:[%s576_s4 + $0x38] sm:$0xff] %vm342_vm1, %v320_v52 }
  0xb3   : > { %v329_v55 = vpop.f32.mrf.mxu2  ;;  %v339_v56 = vpop.f32.mrf.mxu3 }
  0xb4   : > { %v330_v57 = vadd.f32 %v329_v55, %v205_v53  ;;  %v340_v58 = vadd.f32 %v339_v56, %v209_v54 }
  0xb6   : > { %354 = vst.msk [vmem:[%s576_s4 + $0x58] sm:$0xff] %vm342_vm1, %v330_v57 }
  0xb7   : > { %358 = vst.msk [vmem:[%s576_s4 + $0x78] sm:$0xff] %vm342_vm1, %v340_v58 }
  0xb8 PF: > { %s13_s12 = sadd.s32 1, %s513_s12  }
  0xb9   : > { %p10_p4 = scmp.ge.s32.totalorder %s13_s12, 4  }
  0xbb   :  { %12 = sbr.rel (!%p10_p4) target bundleno = 1 (0x1), region = 62 }

</bundles_post_ra>
